<compile_context>
chip_gen: v5e
topology: v5e:2x2
jax: 0.10.0
libtpu: 0.0.40
codegen_flags: <defaults>
</compile_context>

<pallas_src>
import jax
import jax.numpy as jnp
import numpy as np
from jax import lax
from jax.experimental import pallas as pl
from jax.experimental.pallas import tpu as pltpu

# Small, module-consistent sizes.
B = 2            # batch
N_FEAT = 8       # n_feat
KSIZE = 3        # kernel_size
NUM_META = 4     # num_metadata
MID = NUM_META + (N_FEAT - NUM_META) // 2   # intermediate FC width (=6)
H = W = 16       # spatial

BH = B * H                 # 32 matmul rows
WC = W * N_FEAT            # 128 lanes (lane-dense)
LANES = 128                # padded lane width for the tiny metadata MLP
META_ROWS = 8              # padded sublane count for the metadata MLP
H_LOG2 = H.bit_length() - 1
assert H & (H - 1) == 0, "row masks use `& (H-1)` / `>> H_LOG2`; H must be a power of two"
assert B <= META_ROWS


def qrb_kernel(x_ref, meta_ref, fc1w_ref, fc1b_ref, fc2w_ref, fc2b_ref,
               w1_ref, b1_ref, w2_ref, b2_ref, out_ref):
    f = x_ref[...]                                              # (BH, WC) f32

    # ---- ParaCALayer metadata MLP (fused: keeps the whole block one dispatch) ----
    hidden = jnp.maximum(
        jnp.dot(meta_ref[...], fc1w_ref[...],
                preferred_element_type=jnp.float32) + fc1b_ref[...], 0.0)
    z = jnp.dot(hidden, fc2w_ref[...],
                preferred_element_type=jnp.float32) + fc2b_ref[...]
    att = 1.0 / (1.0 + jnp.exp(-z))                             # (META_ROWS, WC), lane-tiled over x

    # Row bookkeeping: y position inside each image + which image a row belongs to.
    row = lax.broadcasted_iota(jnp.int32, (BH, WC), 0)
    y_in_img = row & (H - 1)
    has_up = y_in_img > 0          # a row above exists (dy = -1)
    has_dn = y_in_img < H - 1      # a row below exists (dy = +1)
    img = row >> H_LOG2

    # Broadcast per-image attention gains over the H rows of that image (VPU selects).
    att_rows = att[0:1, :]
    for b in range(1, B):
        att_rows = jnp.where(img == b, att[b:b + 1, :], att_rows)

    def conv3x3(src, w_ref, b_ref):
        # Vertical taps via XLU sublane rolls + border masks (masks also kill the
        # batch-image boundary since wrapped rows always have y==0 or y==H-1).
        up = jnp.where(has_up, pltpu.roll(src, shift=1, axis=0), 0.0)        # F[r-1]
        dn = jnp.where(has_dn, pltpu.roll(src, shift=BH - 1, axis=0), 0.0)   # F[r+1]
        # Horizontal taps + x zero-padding live inside the banded weight blocks.
        # bf16 operands, f32 accumulation; static weight-ref slices are free.
        acc = jnp.dot(up.astype(jnp.bfloat16), w_ref[0:WC, :],
                      preferred_element_type=jnp.float32)
        acc = acc + jnp.dot(src.astype(jnp.bfloat16), w_ref[WC:2 * WC, :],
                            preferred_element_type=jnp.float32)
        acc = acc + jnp.dot(dn.astype(jnp.bfloat16), w_ref[2 * WC:3 * WC, :],
                            preferred_element_type=jnp.float32)
        return acc + b_ref[...]

    h = jnp.maximum(conv3x3(f, w1_ref, b1_ref), 0.0)            # conv1 + ReLU
    y = conv3x3(h, w2_ref, b2_ref)                              # conv2
    out_ref[...] = (y * att_rows + f).astype(out_ref.dtype)     # attention + residual


def _banded_conv_weight(w):
    """(K*K, Cin, Cout) conv weight -> (K*W*C, W*C) banded matmul weight.

    Row index = ky*W*C + x_in*C + cin, column index = x_out*C + cout,
    entry = w[ky, (x_in - x_out) + 1, cin, cout] when |x_in - x_out| <= 1, else 0.
    Missing off-band entries implement the SAME zero-padding along x.
    """
    w = jnp.asarray(w, jnp.float32).reshape(KSIZE, KSIZE, N_FEAT, N_FEAT)
    d = np.arange(W)[:, None] - np.arange(W)[None, :]           # x_in - x_out
    blocks = []
    for ky in range(KSIZE):
        band = jnp.zeros((W, N_FEAT, W, N_FEAT), jnp.float32)
        for kx in range(KSIZE):
            dx = kx - KSIZE // 2
            sel = jnp.asarray(d == dx, jnp.float32)[:, None, :, None]
            band = band + sel * w[ky, kx][None, :, None, :]
        blocks.append(band.reshape(WC, WC))                     # (x_in*C+cin, x_out*C+cout)
    return jnp.concatenate(blocks, axis=0)                      # (K*WC, WC)


def prepare_params(w1, b1, w2, b2, fc1w, fc1b, fc2w, fc2b):
    """One-time parameter prep (NOT in the per-call path)."""
    w1cat = _banded_conv_weight(w1).astype(jnp.bfloat16)        # (3*WC, WC) bf16
    w2cat = _banded_conv_weight(w2).astype(jnp.bfloat16)
    b1w = jnp.tile(jnp.asarray(b1, jnp.float32).reshape(1, N_FEAT), (1, W))   # (1, WC)
    b2w = jnp.tile(jnp.asarray(b2, jnp.float32).reshape(1, N_FEAT), (1, W))
    # Metadata-MLP weights padded to lane/sublane friendly shapes; fc2 pre-tiled
    # across the W positions of a lane row so the kernel's att is already (.., WC).
    fc1wP = jnp.zeros((LANES, LANES), jnp.float32).at[:NUM_META, :MID].set(
        jnp.asarray(fc1w, jnp.float32))
    fc1bP = jnp.zeros((1, LANES), jnp.float32).at[0, :MID].set(
        jnp.asarray(fc1b, jnp.float32).reshape(-1))
    fc2w_tiled = jnp.tile(jnp.asarray(fc2w, jnp.float32), (1, W))             # (MID, WC)
    fc2wP = jnp.zeros((LANES, WC), jnp.float32).at[:MID, :].set(fc2w_tiled)
    fc2bP = jnp.tile(jnp.asarray(fc2b, jnp.float32).reshape(1, N_FEAT), (1, W))
    return w1cat, b1w, w2cat, b2w, fc1wP, fc1bP, fc2wP, fc2bP


_COST = pl.CostEstimate(
    flops=2 * (2 * BH * WC * (KSIZE * WC)) + 2 * (2 * META_ROWS * LANES * LANES),
    transcendentals=META_ROWS * WC,
    bytes_accessed=(2 * BH * WC * 4                 # x in + out
                    + META_ROWS * LANES * 4         # padded metadata
                    + LANES * LANES * 4 + LANES * WC * 4   # padded MLP weights
                    + 2 * (KSIZE * WC * WC * 2)     # banded conv weights (bf16)
                    + 4 * WC * 4 + LANES * 4),      # biases
)


@jax.jit
def qrb_forward(x, meta, w1cat, b1w, w2cat, b2w, fc1wP, fc1bP, fc2wP, fc2bP):
    # lane-dense feature matrix: row = (b, y), lane = x*C + c
    f = x.reshape(BH, WC)
    metaP = jnp.pad(jnp.asarray(meta, jnp.float32),
                    ((0, META_ROWS - B), (0, LANES - NUM_META)))

    full = lambda shape: pl.BlockSpec(shape, lambda i: (0,) * len(shape))
    out = pl.pallas_call(
        qrb_kernel,
        out_shape=jax.ShapeDtypeStruct((BH, WC), jnp.float32),
        grid=(1,),                                              # whole batch in one step
        in_specs=[
            full((BH, WC)),                 # x (residual + conv input)
            full((META_ROWS, LANES)),       # padded metadata
            full((LANES, LANES)),           # fc1 weight (padded)
            full((1, LANES)),               # fc1 bias   (padded)
            full((LANES, WC)),              # fc2 weight (padded + lane-tiled)
            full((1, WC)),                  # fc2 bias   (lane-tiled)
            full((KSIZE * WC, WC)),         # conv1 banded weight (bf16)
            full((1, WC)),                  # conv1 bias (tiled over x)
            full((KSIZE * WC, WC)),         # conv2 banded weight (bf16)
            full((1, WC)),                  # conv2 bias
        ],
        out_specs=full((BH, WC)),
        compiler_params=pltpu.CompilerParams(
            dimension_semantics=("arbitrary",)),
        cost_estimate=_COST,
    )(f, metaP, fc1wP, fc1bP, fc2wP, fc2bP, w1cat, b1w, w2cat, b2w)
    return out.reshape(B, H, W, N_FEAT)


def qrb_reference(x, meta, w1, b1, w2, b2, fc1w, fc1b, fc2w, fc2b):
    """Pure-JAX reference (NHWC, f32)."""
    dn = ('NHWC', 'HWIO', 'NHWC')
    w1_hwio = w1.reshape(KSIZE, KSIZE, N_FEAT, N_FEAT)
    w2_hwio = w2.reshape(KSIZE, KSIZE, N_FEAT, N_FEAT)
    y = lax.conv_general_dilated(x, w1_hwio, (1, 1), 'SAME', dimension_numbers=dn)
    y = jnp.maximum(y + b1.reshape(1, 1, 1, N_FEAT), 0.0)
    y = lax.conv_general_dilated(y, w2_hwio, (1, 1), 'SAME', dimension_numbers=dn)
    y = y + b2.reshape(1, 1, 1, N_FEAT)
    hidden = jnp.maximum(meta @ fc1w + fc1b, 0.0)
    att = jax.nn.sigmoid(hidden @ fc2w + fc2b)                  # (B, C)
    y = y * att[:, None, None, :]
    return y + x


if __name__ == "__main__":
    key = jax.random.PRNGKey(0)
    ks = jax.random.split(key, 12)

    x = jax.random.normal(ks[0], (B, H, W, N_FEAT), jnp.float32)
    meta = jax.random.uniform(ks[1], (B, NUM_META), jnp.float32)

    scale = 0.1
    w1 = scale * jax.random.normal(ks[2], (KSIZE * KSIZE, N_FEAT, N_FEAT), jnp.float32)
    b1 = scale * jax.random.normal(ks[3], (1, N_FEAT), jnp.float32)
    w2 = scale * jax.random.normal(ks[4], (KSIZE * KSIZE, N_FEAT, N_FEAT), jnp.float32)
    b2 = scale * jax.random.normal(ks[5], (1, N_FEAT), jnp.float32)
    fc1w = scale * jax.random.normal(ks[6], (NUM_META, MID), jnp.float32)
    fc1b = scale * jax.random.normal(ks[7], (1, MID), jnp.float32)
    fc2w = scale * jax.random.normal(ks[8], (MID, N_FEAT), jnp.float32)
    fc2b = scale * jax.random.normal(ks[9], (1, N_FEAT), jnp.float32)

    # One-time parameter prep (banded / padded / bf16 weights) outside the call path.
    prepped = prepare_params(w1, b1, w2, b2, fc1w, fc1b, fc2w, fc2b)

    out = qrb_forward(x, meta, *prepped)
    out = jax.block_until_ready(out)

    ref = qrb_reference(x, meta, w1, b1, w2, b2, fc1w, fc1b, fc2w, fc2b)
    # Tolerance relaxed vs pure-f32 because conv MXU operands are bf16 (f32 accumulate).
    np.testing.assert_allclose(np.asarray(out), np.asarray(ref), rtol=1e-2, atol=1e-2)

    print("KERNEL_OK")
</pallas_src>

<mosaic_0001>
module attributes {stable_mosaic.version = 11 : i64} {
  func.func @qrb_kernel(%arg0: i32, %arg1: memref<32x128xf32, #tpu.memory_space<vmem>>, %arg2: memref<8x128xf32, #tpu.memory_space<vmem>>, %arg3: memref<128x128xf32, #tpu.memory_space<vmem>>, %arg4: memref<1x128xf32, #tpu.memory_space<vmem>>, %arg5: memref<128x128xf32, #tpu.memory_space<vmem>>, %arg6: memref<1x128xf32, #tpu.memory_space<vmem>>, %arg7: memref<384x128xbf16, #tpu.memory_space<vmem>>, %arg8: memref<1x128xf32, #tpu.memory_space<vmem>>, %arg9: memref<384x128xbf16, #tpu.memory_space<vmem>>, %arg10: memref<1x128xf32, #tpu.memory_space<vmem>>, %arg11: memref<32x128xf32, #tpu.memory_space<vmem>>) attributes {dimension_semantics = [#tpu.dimension_semantics<arbitrary>], iteration_bounds = array<i64: 1>, scalar_prefetch = 0 : i64, scratch_operands = 0 : i64, tpu.core_type = #tpu.core_type<tc>, window_params = [{pipeline_mode = #tpu.pipeline_mode<synchronous>, transform_indices = @transform_0, window_bounds = array<i64: 32, 128>}, {pipeline_mode = #tpu.pipeline_mode<synchronous>, transform_indices = @transform_1, window_bounds = array<i64: 8, 128>}, {pipeline_mode = #tpu.pipeline_mode<synchronous>, transform_indices = @transform_2, window_bounds = array<i64: 128, 128>}, {pipeline_mode = #tpu.pipeline_mode<synchronous>, transform_indices = @transform_3, window_bounds = array<i64: 1, 128>}, {pipeline_mode = #tpu.pipeline_mode<synchronous>, transform_indices = @transform_4, window_bounds = array<i64: 128, 128>}, {pipeline_mode = #tpu.pipeline_mode<synchronous>, transform_indices = @transform_5, window_bounds = array<i64: 1, 128>}, {pipeline_mode = #tpu.pipeline_mode<synchronous>, transform_indices = @transform_6, window_bounds = array<i64: 384, 128>}, {pipeline_mode = #tpu.pipeline_mode<synchronous>, transform_indices = @transform_7, window_bounds = array<i64: 1, 128>}, {pipeline_mode = #tpu.pipeline_mode<synchronous>, transform_indices = @transform_8, window_bounds = array<i64: 384, 128>}, {pipeline_mode = #tpu.pipeline_mode<synchronous>, transform_indices = @transform_9, window_bounds = array<i64: 1, 128>}, {pipeline_mode = #tpu.pipeline_mode<synchronous>, transform_indices = @transform_10, window_bounds = array<i64: 32, 128>}]} {
    %c0 = arith.constant 0 : index
    %c0_0 = arith.constant 0 : index
    %0 = vector.load %arg1[%c0, %c0_0] : memref<32x128xf32, #tpu.memory_space<vmem>>, vector<32x128xf32>
    %c0_1 = arith.constant 0 : index
    %c0_2 = arith.constant 0 : index
    %1 = vector.load %arg2[%c0_1, %c0_2] : memref<8x128xf32, #tpu.memory_space<vmem>>, vector<8x128xf32>
    %c0_3 = arith.constant 0 : index
    %c0_4 = arith.constant 0 : index
    %2 = vector.load %arg3[%c0_3, %c0_4] : memref<128x128xf32, #tpu.memory_space<vmem>>, vector<128x128xf32>
    %cst = arith.constant dense<0.000000e+00> : vector<8x128xf32>
    %3 = tpu.matmul %1, %2, %cst {dimension_numbers = #tpu.dot_dimension_numbers<[1], [0], [0], [1], [0, 0, 1, 1], [], []>} : vector<8x128xf32>, vector<128x128xf32>, vector<8x128xf32> -> vector<8x128xf32>
    %c0_5 = arith.constant 0 : index
    %c0_6 = arith.constant 0 : index
    %4 = vector.load %arg4[%c0_5, %c0_6] : memref<1x128xf32, #tpu.memory_space<vmem>>, vector<1x128xf32>
    %5 = vector.broadcast %4 : vector<1x128xf32> to vector<8x128xf32>
    %6 = arith.addf %3, %5 : vector<8x128xf32>
    %cst_7 = arith.constant 0.000000e+00 : f32
    %7 = vector.broadcast %cst_7 : f32 to vector<8x128xf32>
    %8 = arith.maximumf %6, %7 : vector<8x128xf32>
    %c0_8 = arith.constant 0 : index
    %c0_9 = arith.constant 0 : index
    %9 = vector.load %arg5[%c0_8, %c0_9] : memref<128x128xf32, #tpu.memory_space<vmem>>, vector<128x128xf32>
    %cst_10 = arith.constant dense<0.000000e+00> : vector<8x128xf32>
    %10 = tpu.matmul %8, %9, %cst_10 {dimension_numbers = #tpu.dot_dimension_numbers<[1], [0], [0], [1], [0, 0, 1, 1], [], []>} : vector<8x128xf32>, vector<128x128xf32>, vector<8x128xf32> -> vector<8x128xf32>
    %c0_11 = arith.constant 0 : index
    %c0_12 = arith.constant 0 : index
    %11 = vector.load %arg6[%c0_11, %c0_12] : memref<1x128xf32, #tpu.memory_space<vmem>>, vector<1x128xf32>
    %12 = vector.broadcast %11 : vector<1x128xf32> to vector<8x128xf32>
    %13 = arith.addf %10, %12 : vector<8x128xf32>
    %cst_13 = arith.constant 0.000000e+00 : f32
    %14 = vector.broadcast %cst_13 : f32 to vector<8x128xf32>
    %15 = arith.subf %14, %13 : vector<8x128xf32>
    %16 = math.exp %15 : vector<8x128xf32>
    %cst_14 = arith.constant 1.000000e+00 : f32
    %17 = vector.broadcast %cst_14 : f32 to vector<8x128xf32>
    %18 = arith.addf %17, %16 : vector<8x128xf32>
    %cst_15 = arith.constant 1.000000e+00 : f32
    %19 = vector.broadcast %cst_15 : f32 to vector<8x128xf32>
    %20 = arith.divf %19, %18 : vector<8x128xf32>
    %21 = tpu.iota {dimensions = array<i32: 0>} : vector<32x128xi32>
    %c15_i32 = arith.constant 15 : i32
    %22 = vector.broadcast %c15_i32 : i32 to vector<32x128xi32>
    %23 = arith.andi %21, %22 : vector<32x128xi32>
    %c0_i32 = arith.constant 0 : i32
    %24 = vector.broadcast %c0_i32 : i32 to vector<32x128xi32>
    %25 = arith.cmpi sgt, %23, %24 : vector<32x128xi32>
    %c15_i32_16 = arith.constant 15 : i32
    %26 = vector.broadcast %c15_i32_16 : i32 to vector<32x128xi32>
    %27 = arith.cmpi slt, %23, %26 : vector<32x128xi32>
    %c4_i32 = arith.constant 4 : i32
    %28 = vector.broadcast %c4_i32 : i32 to vector<32x128xi32>
    %29 = arith.shrsi %21, %28 : vector<32x128xi32>
    %30 = vector.extract_strided_slice %20 {offsets = [0, 0], sizes = [1, 128], strides = [1, 1]} : vector<8x128xf32> to vector<1x128xf32>
    %c1_i32 = arith.constant 1 : i32
    %31 = vector.broadcast %c1_i32 : i32 to vector<32x128xi32>
    %32 = arith.cmpi eq, %29, %31 : vector<32x128xi32>
    %33 = vector.extract_strided_slice %20 {offsets = [1, 0], sizes = [1, 128], strides = [1, 1]} : vector<8x128xf32> to vector<1x128xf32>
    %34 = vector.shape_cast %33 : vector<1x128xf32> to vector<1x128xf32>
    %35 = vector.broadcast %34 : vector<1x128xf32> to vector<32x128xf32>
    %36 = vector.shape_cast %30 : vector<1x128xf32> to vector<1x128xf32>
    %37 = vector.broadcast %36 : vector<1x128xf32> to vector<32x128xf32>
    %38 = arith.select %32, %35, %37 : vector<32x128xi1>, vector<32x128xf32>
    %c1_i32_17 = arith.constant 1 : i32
    %39 = tpu.dynamic_rotate %0 by %c1_i32_17 dim 0 : vector<32x128xf32>, i32 -> vector<32x128xf32>
    %cst_18 = arith.constant 0.000000e+00 : f32
    %40 = vector.broadcast %cst_18 : f32 to vector<32x128xf32>
    %41 = arith.select %25, %39, %40 : vector<32x128xi1>, vector<32x128xf32>
    %c31_i32 = arith.constant 31 : i32
    %42 = tpu.dynamic_rotate %0 by %c31_i32 dim 0 : vector<32x128xf32>, i32 -> vector<32x128xf32>
    %cst_19 = arith.constant 0.000000e+00 : f32
    %43 = vector.broadcast %cst_19 : f32 to vector<32x128xf32>
    %44 = arith.select %27, %42, %43 : vector<32x128xi1>, vector<32x128xf32>
    %45 = arith.truncf %41 : vector<32x128xf32> to vector<32x128xbf16>
    %c0_20 = arith.constant 0 : index
    %c0_21 = arith.constant 0 : index
    %46 = vector.load %arg7[%c0_20, %c0_21] : memref<384x128xbf16, #tpu.memory_space<vmem>>, vector<128x128xbf16>
    %cst_22 = arith.constant dense<0.000000e+00> : vector<32x128xf32>
    %47 = tpu.matmul %45, %46, %cst_22 {dimension_numbers = #tpu.dot_dimension_numbers<[1], [0], [0], [1], [0, 0, 1, 1], [], []>} : vector<32x128xbf16>, vector<128x128xbf16>, vector<32x128xf32> -> vector<32x128xf32>
    %48 = arith.truncf %0 : vector<32x128xf32> to vector<32x128xbf16>
    %c128 = arith.constant 128 : index
    %c0_23 = arith.constant 0 : index
    %49 = vector.load %arg7[%c128, %c0_23] : memref<384x128xbf16, #tpu.memory_space<vmem>>, vector<128x128xbf16>
    %cst_24 = arith.constant dense<0.000000e+00> : vector<32x128xf32>
    %50 = tpu.matmul %48, %49, %cst_24 {dimension_numbers = #tpu.dot_dimension_numbers<[1], [0], [0], [1], [0, 0, 1, 1], [], []>} : vector<32x128xbf16>, vector<128x128xbf16>, vector<32x128xf32> -> vector<32x128xf32>
    %51 = arith.addf %47, %50 : vector<32x128xf32>
    %52 = arith.truncf %44 : vector<32x128xf32> to vector<32x128xbf16>
    %c256 = arith.constant 256 : index
    %c0_25 = arith.constant 0 : index
    %53 = vector.load %arg7[%c256, %c0_25] : memref<384x128xbf16, #tpu.memory_space<vmem>>, vector<128x128xbf16>
    %cst_26 = arith.constant dense<0.000000e+00> : vector<32x128xf32>
    %54 = tpu.matmul %52, %53, %cst_26 {dimension_numbers = #tpu.dot_dimension_numbers<[1], [0], [0], [1], [0, 0, 1, 1], [], []>} : vector<32x128xbf16>, vector<128x128xbf16>, vector<32x128xf32> -> vector<32x128xf32>
    %55 = arith.addf %51, %54 : vector<32x128xf32>
    %c0_27 = arith.constant 0 : index
    %c0_28 = arith.constant 0 : index
    %56 = vector.load %arg8[%c0_27, %c0_28] : memref<1x128xf32, #tpu.memory_space<vmem>>, vector<1x128xf32>
    %57 = vector.broadcast %56 : vector<1x128xf32> to vector<32x128xf32>
    %58 = arith.addf %55, %57 : vector<32x128xf32>
    %cst_29 = arith.constant 0.000000e+00 : f32
    %59 = vector.broadcast %cst_29 : f32 to vector<32x128xf32>
    %60 = arith.maximumf %58, %59 : vector<32x128xf32>
    %c1_i32_30 = arith.constant 1 : i32
    %61 = tpu.dynamic_rotate %60 by %c1_i32_30 dim 0 : vector<32x128xf32>, i32 -> vector<32x128xf32>
    %cst_31 = arith.constant 0.000000e+00 : f32
    %62 = vector.broadcast %cst_31 : f32 to vector<32x128xf32>
    %63 = arith.select %25, %61, %62 : vector<32x128xi1>, vector<32x128xf32>
    %c31_i32_32 = arith.constant 31 : i32
    %64 = tpu.dynamic_rotate %60 by %c31_i32_32 dim 0 : vector<32x128xf32>, i32 -> vector<32x128xf32>
    %cst_33 = arith.constant 0.000000e+00 : f32
    %65 = vector.broadcast %cst_33 : f32 to vector<32x128xf32>
    %66 = arith.select %27, %64, %65 : vector<32x128xi1>, vector<32x128xf32>
    %67 = arith.truncf %63 : vector<32x128xf32> to vector<32x128xbf16>
    %c0_34 = arith.constant 0 : index
    %c0_35 = arith.constant 0 : index
    %68 = vector.load %arg9[%c0_34, %c0_35] : memref<384x128xbf16, #tpu.memory_space<vmem>>, vector<128x128xbf16>
    %cst_36 = arith.constant dense<0.000000e+00> : vector<32x128xf32>
    %69 = tpu.matmul %67, %68, %cst_36 {dimension_numbers = #tpu.dot_dimension_numbers<[1], [0], [0], [1], [0, 0, 1, 1], [], []>} : vector<32x128xbf16>, vector<128x128xbf16>, vector<32x128xf32> -> vector<32x128xf32>
    %70 = arith.truncf %60 : vector<32x128xf32> to vector<32x128xbf16>
    %c128_37 = arith.constant 128 : index
    %c0_38 = arith.constant 0 : index
    %71 = vector.load %arg9[%c128_37, %c0_38] : memref<384x128xbf16, #tpu.memory_space<vmem>>, vector<128x128xbf16>
    %cst_39 = arith.constant dense<0.000000e+00> : vector<32x128xf32>
    %72 = tpu.matmul %70, %71, %cst_39 {dimension_numbers = #tpu.dot_dimension_numbers<[1], [0], [0], [1], [0, 0, 1, 1], [], []>} : vector<32x128xbf16>, vector<128x128xbf16>, vector<32x128xf32> -> vector<32x128xf32>
    %73 = arith.addf %69, %72 : vector<32x128xf32>
    %74 = arith.truncf %66 : vector<32x128xf32> to vector<32x128xbf16>
    %c256_40 = arith.constant 256 : index
    %c0_41 = arith.constant 0 : index
    %75 = vector.load %arg9[%c256_40, %c0_41] : memref<384x128xbf16, #tpu.memory_space<vmem>>, vector<128x128xbf16>
    %cst_42 = arith.constant dense<0.000000e+00> : vector<32x128xf32>
    %76 = tpu.matmul %74, %75, %cst_42 {dimension_numbers = #tpu.dot_dimension_numbers<[1], [0], [0], [1], [0, 0, 1, 1], [], []>} : vector<32x128xbf16>, vector<128x128xbf16>, vector<32x128xf32> -> vector<32x128xf32>
    %77 = arith.addf %73, %76 : vector<32x128xf32>
    %c0_43 = arith.constant 0 : index
    %c0_44 = arith.constant 0 : index
    %78 = vector.load %arg10[%c0_43, %c0_44] : memref<1x128xf32, #tpu.memory_space<vmem>>, vector<1x128xf32>
    %79 = vector.broadcast %78 : vector<1x128xf32> to vector<32x128xf32>
    %80 = arith.addf %77, %79 : vector<32x128xf32>
    %81 = arith.mulf %80, %38 : vector<32x128xf32>
    %82 = arith.addf %81, %0 : vector<32x128xf32>
    %c0_45 = arith.constant 0 : index
    %c0_46 = arith.constant 0 : index
    %83 = vector.load %arg11[%c0_45, %c0_46] : memref<32x128xf32, #tpu.memory_space<vmem>>, vector<32x128xf32>
    tpu.vector_store %arg11[%c0_45, %c0_46], %82 {strides = array<i32>} : memref<32x128xf32, #tpu.memory_space<vmem>>, vector<32x128xf32>,
    return
  }
  func.func @transform_0(%arg0: i32) -> (i32, i32) {
    %c0_i32 = arith.constant 0 : i32
    %c0_i32_0 = arith.constant 0 : i32
    %c0_i32_1 = arith.constant 0 : i32
    return %c0_i32, %c0_i32_0 : i32, i32
  }
  func.func @transform_1(%arg0: i32) -> (i32, i32) {
    %c0_i32 = arith.constant 0 : i32
    %c0_i32_0 = arith.constant 0 : i32
    %c0_i32_1 = arith.constant 0 : i32
    return %c0_i32, %c0_i32_0 : i32, i32
  }
  func.func @transform_2(%arg0: i32) -> (i32, i32) {
    %c0_i32 = arith.constant 0 : i32
    %c0_i32_0 = arith.constant 0 : i32
    %c0_i32_1 = arith.constant 0 : i32
    return %c0_i32, %c0_i32_0 : i32, i32
  }
  func.func @transform_3(%arg0: i32) -> (i32, i32) {
    %c0_i32 = arith.constant 0 : i32
    %c0_i32_0 = arith.constant 0 : i32
    %c0_i32_1 = arith.constant 0 : i32
    return %c0_i32, %c0_i32_0 : i32, i32
  }
  func.func @transform_4(%arg0: i32) -> (i32, i32) {
    %c0_i32 = arith.constant 0 : i32
    %c0_i32_0 = arith.constant 0 : i32
    %c0_i32_1 = arith.constant 0 : i32
    return %c0_i32, %c0_i32_0 : i32, i32
  }
  func.func @transform_5(%arg0: i32) -> (i32, i32) {
    %c0_i32 = arith.constant 0 : i32
    %c0_i32_0 = arith.constant 0 : i32
    %c0_i32_1 = arith.constant 0 : i32
    return %c0_i32, %c0_i32_0 : i32, i32
  }
  func.func @transform_6(%arg0: i32) -> (i32, i32) {
    %c0_i32 = arith.constant 0 : i32
    %c0_i32_0 = arith.constant 0 : i32
    %c0_i32_1 = arith.constant 0 : i32
    return %c0_i32, %c0_i32_0 : i32, i32
  }
  func.func @transform_7(%arg0: i32) -> (i32, i32) {
    %c0_i32 = arith.constant 0 : i32
    %c0_i32_0 = arith.constant 0 : i32
    %c0_i32_1 = arith.constant 0 : i32
    return %c0_i32, %c0_i32_0 : i32, i32
  }
  func.func @transform_8(%arg0: i32) -> (i32, i32) {
    %c0_i32 = arith.constant 0 : i32
    %c0_i32_0 = arith.constant 0 : i32
    %c0_i32_1 = arith.constant 0 : i32
    return %c0_i32, %c0_i32_0 : i32, i32
  }
  func.func @transform_9(%arg0: i32) -> (i32, i32) {
    %c0_i32 = arith.constant 0 : i32
    %c0_i32_0 = arith.constant 0 : i32
    %c0_i32_1 = arith.constant 0 : i32
    return %c0_i32, %c0_i32_0 : i32, i32
  }
  func.func @transform_10(%arg0: i32) -> (i32, i32) {
    %c0_i32 = arith.constant 0 : i32
    %c0_i32_0 = arith.constant 0 : i32
    %c0_i32_1 = arith.constant 0 : i32
    return %c0_i32, %c0_i32_0 : i32, i32
  }
}

</mosaic_0001>

<bundles_post_ra>
// kernel: qrb_forward.1
= control target key start
LH: loop header
LB: loop body
LE: loop exit
PB: predicated region body
PF: predicated region fallthrough
CT: control target
= control target key end

     0   :  { %v140_v21 = vlaneseq  ;;  %vm1048_vm2 = vmmov 1   ;;  %s1496_s2 = inlined_call_operand.vmem [shape: f32[128,128], index: 2, kind: input, shape index: {}]   ;;  %s1497_s6 = inlined_call_operand.vmem [shape: bf16[384,128], index: 6, kind: input, shape index: {}]   ;;  %s1498_s3 = inlined_call_operand.vmem [shape: f32[1,128], index: 3, kind: input, shape index: {}]   ;;  %s1499_s0 = inlined_call_operand.vmem [shape: f32[32,128], index: 0, kind: input, shape index: {}]   ;;  %s1500_s1 = inlined_call_operand.vmem [shape: f32[8,128], index: 1, kind: input, shape index: {}]   ;;  %s1501_s4 = inlined_call_operand.vmem [shape: f32[128,128], index: 4, kind: input, shape index: {}]   ;;  %s1502_s7 = inlined_call_operand.vmem [shape: f32[1,128], index: 7, kind: input, shape index: {}]   ;;  %s1503_s5 = inlined_call_operand.vmem [shape: f32[1,128], index: 5, kind: input, shape index: {}]   ;;  %s1504_s8 = inlined_call_operand.vmem [shape: bf16[384,128], index: 8, kind: input, shape index: {}]   ;;  %s1505_s9 = inlined_call_operand.vmem [shape: f32[1,128], index: 9, kind: input, shape index: {}]   ;;  %s1506_s10 = inlined_call_operand.vmem [shape: f32[32,128], index: 10, kind: output, shape index: {}]  }
   0x1   :  { %v55_v0 = vld [vmem:[%s1496_s2 + $0x78] sm:$0xff]  ;;  %v54_v1 = vld [vmem:[%s1496_s2 + $0x70] sm:$0xff]  ;;  %v53_v2 = vld [vmem:[%s1496_s2 + $0x68] sm:$0xff] }
   0x2   :  { %60 = vmatpush.msra.mxu0 %v55_v0  ;;  %v1006_v3 = vld [vmem:[%s1497_s6 + $0x78] sm:$0xff]  ;;  %v52_v5 = vld [vmem:[%s1496_s2 + $0x60] sm:$0xff]  ;;  %v1005_v6 = vld [vmem:[%s1497_s6 + $0x70] sm:$0xff]  ;;  %v1194_v29 = vshrl.u32 %v140_v21, 7 }
   0x3   :  { %v998_v4 = vld [vmem:[%s1497_s6 + $0x38] sm:$0xff]  ;;  %281 = vmatpush.bf16.msra.mxu2 %v1006_v3  ;;  %v997_v7 = vld [vmem:[%s1497_s6 + $0x30] sm:$0xff]  ;;  %v1004_v10 = vld [vmem:[%s1497_s6 + $0x68] sm:$0xff] }
   0x4   :  { %61 = vmatpush.msra.mxu0 %v54_v1  ;;  %348 = vmatpush.bf16.msra.mxu3 %v998_v4  ;;  %v51_v8 = vld [vmem:[%s1496_s2 + $0x58] sm:$0xff]  ;;  %v50_v9 = vld [vmem:[%s1496_s2 + $0x50] sm:$0xff]  ;;  %v996_v11 = vld [vmem:[%s1497_s6 + $0x28] sm:$0xff]  ;;  %v145_v37 = vand.u32 15, %v1194_v29  ;;  %vm175_vm0 = vcmp.lt.s32.totalorder %v1194_v29, 1  ;;  %v1253_v51 = vadd.s32 16, %v1194_v29 }
   0x5   :  { %v49_v12 = vld [vmem:[%s1496_s2 + $0x48] sm:$0xff]  ;;  %v48_v13 = vld [vmem:[%s1496_s2 + $0x40] sm:$0xff]  ;;  %v47_v16 = vld [vmem:[%s1496_s2 + $0x38] sm:$0xff]  ;;  %v1284_v0 = vadd.s32 8, %v1194_v29  ;;  %vm188_vm6 = vcmp.lt.s32.totalorder %v1194_v29, 7 }
   0x6   :  { %62 = vmatpush.msra.mxu0 %v53_v2  ;;  %v1003_v14 = vld [vmem:[%s1497_s6 + $0x60] sm:$0xff]  ;;  %v46_v17 = vld [vmem:[%s1496_s2 + $0x30] sm:$0xff]  ;;  %v1002_v18 = vld [vmem:[%s1497_s6 + $0x58] sm:$0xff]  ;;  %vm149_vm1 = vcmp.gt.s32.totalorder %v145_v37, 0  ;;  %v147_v54 = vand.u32 15, %v1253_v51 }
   0x7   :  { %282 = vmatpush.bf16.msra.mxu2 %v1005_v6  ;;  %v995_v15 = vld [vmem:[%s1497_s6 + $0x20] sm:$0xff]  ;;  %v994_v19 = vld [vmem:[%s1497_s6 + $0x18] sm:$0xff]  ;;  %v45_v20 = vld [vmem:[%s1496_s2 + $0x28] sm:$0xff] }
   0x8   :  { %63 = vmatpush.msra.mxu0 %v52_v5  ;;  %349 = vmatpush.bf16.msra.mxu3 %v997_v7  ;;  %v44_v22 = vld [vmem:[%s1496_s2 + $0x20] sm:$0xff]  ;;  %v1001_v23 = vld [vmem:[%s1497_s6 + $0x50] sm:$0xff]  ;;  %v43_v24 = vld [vmem:[%s1496_s2 + $0x18] sm:$0xff]  ;;  %vm151_vm4 = vcmp.gt.s32.totalorder %v147_v54, 0  ;;  %v146_v7 = vand.u32 15, %v1284_v0 }
   0x9   :  { %v993_v25 = vld [vmem:[%s1497_s6 + $0x10] sm:$0xff]  ;;  %v1182_v26 = vld [vmem:[%s1499_s0] sm:$0xff]  ;;  %v1187_v27 = vld [vmem:[%s1499_s0 + $0x8] sm:$0xff] }
   0xa   :  { %64 = vmatpush.msra.mxu0 %v51_v8  ;;  %v1192_v28 = vld [vmem:[%s1499_s0 + $0x18] sm:$0xff]  ;;  %v42_v30 = vld [vmem:[%s1496_s2 + $0x10] sm:$0xff]  ;;  %v1000_v31 = vld [vmem:[%s1497_s6 + $0x48] sm:$0xff]  ;;  %v171_v33 = vrot.slane %v1182_v26, 7  ;;  %v172_v34 = vrot.slane %v1187_v27, 7  ;;  %v215_v45 = vpack.c.bf16 %v1187_v27, %v1182_v26  ;;  %v184_v2 = vrot.slane %v1182_v26, 1 }
   0xb   :  { %283 = vmatpush.bf16.msra.mxu2 %v1004_v10  ;;  %v992_v32 = vld [vmem:[%s1497_s6 + $0x8] sm:$0xff]  ;;  %v174_v35 = vrot.slane %v1192_v28, 7  ;;  %v40_v38 = vld [vmem:[%s1496_s2] sm:$0xff]  ;;  %v1014_v39 = vld [vmem:[%s1497_s6 + $0xb8] sm:$0xff]  ;;  %v185_v3 = vrot.slane %v1187_v27, 1  ;;  %vm154_vm7 = vcmp.lt.s32.totalorder %v146_v7, 15 }
   0xc   :  { %65 = vmatpush.msra.mxu0 %v50_v9  ;;  %350 = vmatpush.bf16.msra.mxu3 %v996_v11  ;;  %v41_v36 = vld [vmem:[%s1496_s2 + $0x8] sm:$0xff]  ;;  %v999_v40 = vld [vmem:[%s1497_s6 + $0x40] sm:$0xff]  ;;  %v178_v42 = vsel %vm175_vm0, %v171_v33, %v172_v34  ;;  %v1013_v46 = vld [vmem:[%s1497_s6 + $0xb0] sm:$0xff]  ;;  %v187_v21 = vrot.slane %v1192_v28, 1 }
   0xd   :  { %v991_v41 = vld [vmem:[%s1497_s6] sm:$0xff]  ;;  %v179_v43 = vsel %vm175_vm0, %v174_v35, %v171_v33  ;;  %vm1238_vm3 = vmpackc.low %vm1048_vm2, %vm149_vm1  ;;  %v1012_v49 = vld [vmem:[%s1497_s6 + $0xa8] sm:$0xff]  ;;  %v191_v11 = vsel %vm188_vm6, %v184_v2, %v185_v3 }
   0xe   :  { %66 = vmatpush.msra.mxu0 %v49_v12  ;;  %v39_v44 = vld [vmem:[%s1500_s1] sm:$0xff]  ;;  %v840_v47 = vpack.c.bf16 %v178_v42, %v179_v43  ;;  %v1250_v50 = vld [vmem:[%s1499_s0 + $0x10] sm:$0xff]  ;;  %v1010_v55 = vld [vmem:[%s1497_s6 + $0x98] sm:$0xff] }
   0xf   :  { %284 = vmatpush.bf16.msra.mxu2 %v1003_v14  ;;  %v1011_v52 = vld [vmem:[%s1497_s6 + $0xa0] sm:$0xff]  ;;  %v173_v53 = vrot.slane %v1250_v50, 7  ;;  %v216_v58 = vpack.c.bf16 %v1192_v28, %v1250_v50  ;;  %v96_v59 = vld [vmem:[%s1501_s4 + $0x78] sm:$0xff]  ;;  %v95_v60 = vld [vmem:[%s1501_s4 + $0x70] sm:$0xff]  ;;  %v186_v5 = vrot.slane %v1250_v50, 1 }
  0x10   :  { %67 = vmatpush.msra.mxu0 %v48_v13  ;;  %351 = vmatpush.bf16.msra.mxu3 %v995_v15  ;;  %v1009_v61 = vld [vmem:[%s1497_s6 + $0x90] sm:$0xff]  ;;  %vm1279_vm5 = vmpackc.low %vm1048_vm2, %vm151_vm4  ;;  %v94_v1 = vld [vmem:[%s1501_s4 + $0x68] sm:$0xff] }
  0x11   :  { %v176_v56 = vsel %vm175_vm0, %v173_v53, %v174_v35  ;;  %v177_v57 = vsel %vm175_vm0, %v172_v34, %v173_v53  ;;  %101 = vmatpush.msra.mxu1 %v96_v59  ;;  %v1008_v4 = vld [vmem:[%s1497_s6 + $0x88] sm:$0xff]  ;;  %v93_v6 = vld [vmem:[%s1501_s4 + $0x60] sm:$0xff]  ;;  %v92_v8 = vld [vmem:[%s1501_s4 + $0x58] sm:$0xff]  ;;  %v190_v10 = vsel %vm188_vm6, %v185_v3, %v186_v5 }
  0x12   :  { %68 = vmatpush.msra.mxu0 %v47_v16  ;;  %v843_v62 = vpack.c.bf16 %v176_v56, %v177_v57  ;;  %v1007_v9 = vld [vmem:[%s1497_s6 + $0x80] sm:$0xff]  ;;  %v91_v12 = vld [vmem:[%s1501_s4 + $0x50] sm:$0xff]  ;;  %v90_v13 = vld [vmem:[%s1501_s4 + $0x48] sm:$0xff]  ;;  %v878_v14 = vpack.c.bf16 %v190_v10, %v191_v11 }
  0x13   :  { %285 = vmatpush.bf16.msra.mxu2 %v1002_v18  ;;  %102 = vmatpush.msra.mxu1 %v95_v60  ;;  %vm1319_vm8 = vmpackc.low %vm154_vm7, %vm1048_vm2  ;;  %v89_v16 = vld [vmem:[%s1501_s4 + $0x40] sm:$0xff]  ;;  %v87_v18 = vld [vmem:[%s1501_s4 + $0x30] sm:$0xff] }
  0x14   :  { %69 = vmatpush.msra.mxu0 %v46_v17  ;;  %352 = vmatpush.bf16.msra.mxu3 %v994_v19  ;;  %v88_v17 = vld [vmem:[%s1501_s4 + $0x38] sm:$0xff]  ;;  %v1335_v19 = vadd.s32 24, %v1194_v29  ;;  %v83_v33 = vld [vmem:[%s1501_s4 + $0x10] sm:$0xff]  ;;  %v82_v34 = vld [vmem:[%s1501_s4 + $0x8] sm:$0xff] }
  0x15   :  { %103 = vmatpush.msra.mxu1 %v94_v1  ;;  %v81_v35 = vld [vmem:[%s1501_s4] sm:$0xff]  ;;  %v1029_v37 = vld [vmem:[%s1504_s8 + $0x70] sm:$0xff]  ;;  %v1026_v43 = vld [vmem:[%s1504_s8 + $0x58] sm:$0xff] }
  0x16   :  { %70 = vmatpush.msra.mxu0 %v45_v20  ;;  %v86_v20 = vld [vmem:[%s1501_s4 + $0x28] sm:$0xff]  ;;  %v1037_v42 = vld [vmem:[%s1504_s8 + $0xb0] sm:$0xff]  ;;  %v1035_v54 = vld [vmem:[%s1504_s8 + $0xa0] sm:$0xff] }
  0x17   :  { %286 = vmatpush.bf16.msra.mxu2 %v1001_v23  ;;  %104 = vmatpush.msra.mxu1 %v93_v6  ;;  %v148_v23 = vand.u32 15, %v1335_v19  ;;  %v1021_v53 = vld [vmem:[%s1504_s8 + $0x30] sm:$0xff]  ;;  %v1020_v56 = vld [vmem:[%s1504_s8 + $0x28] sm:$0xff]  ;;  %v1034_v57 = vld [vmem:[%s1504_s8 + $0x98] sm:$0xff] }
  0x18   :  { %71 = vmatpush.msra.mxu0 %v44_v22  ;;  %353 = vmatpush.bf16.msra.mxu3 %v993_v25  ;;  %v85_v22 = vld [vmem:[%s1501_s4 + $0x20] sm:$0xff]  ;;  %v189_v25 = vsel %vm188_vm6, %v186_v5, %v187_v21  ;;  %v1033_v60 = vld [vmem:[%s1504_s8 + $0x90] sm:$0xff]  ;;  %v1016_v5 = vld [vmem:[%s1504_s8 + $0x8] sm:$0xff] }
  0x19   :  { %105 = vmatpush.msra.mxu1 %v92_v8  ;;  %vm156_vm9 = vcmp.lt.s32.totalorder %v148_v23, 15  ;;  %v1019_v59 = vld [vmem:[%s1504_s8 + $0x20] sm:$0xff]  ;;  %v1017_v3 = vld [vmem:[%s1504_s8 + $0x10] sm:$0xff] }
  0x1a   :  { %72 = vmatpush.msra.mxu0 %v43_v24  ;;  %v84_v24 = vld [vmem:[%s1501_s4 + $0x18] sm:$0xff]  ;;  %vm1353_vm10 = vmpackc.low %vm156_vm9, %vm1048_vm2  ;;  %v1015_v7 = vld [vmem:[%s1504_s8] sm:$0xff] }
  0x1b   :  { %287 = vmatpush.bf16.msra.mxu2 %v1000_v31  ;;  %106 = vmatpush.msra.mxu1 %v91_v12  ;;  %v1041_v12 = vld [vmem:[%s1502_s7] ss:$0 sm:$0xff] }
  0x1c   :  { %73 = vmatpush.msra.mxu0 %v42_v30  ;;  %354 = vmatpush.bf16.msra.mxu3 %v992_v32  ;;  %v192_v30 = vsel %vm188_vm6, %v187_v21, %v184_v2  ;;  %v1042_v48 = vld [vmem:[%s1503_s5] ss:$0 sm:$0xff] }
  0x1d   :  { %107 = vmatpush.msra.mxu1 %v90_v13  ;;  %v881_v31 = vpack.c.bf16 %v192_v30, %v189_v25 }
  0x1e   :  { %74 = vmatpush.msra.mxu0 %v41_v36  ;;  %v1030_v36 = vld [vmem:[%s1504_s8 + $0x78] sm:$0xff] }
  0x1f   :  { %288 = vmatpush.bf16.msra.mxu2 %v999_v40  ;;  %108 = vmatpush.msra.mxu1 %v89_v16  ;;  %v1027_v40 = vld [vmem:[%s1504_s8 + $0x60] sm:$0xff] }
  0x20   :  { %75 = vmatpush.msra.mxu0 %v40_v38  ;;  %355 = vmatpush.bf16.msra.mxu3 %v991_v41  ;;  %v1038_v38 = vld [vmem:[%s1504_s8 + $0xb8] sm:$0xff]  ;;  %v1040_v41 = vld [vmem:[%s1498_s3] ss:$0 sm:$0xff] }
  0x21   :  { %76 = vmatmul.f32.vlgmr.msra.gmra.mxu0 %v39_v44  ;;  %109 = vmatpush.msra.mxu1 %v88_v17 }
  0x22   :  { %433 = vmatpush.bf16.msrb.mxu0 %v1014_v39  ;;  %289 = vmatmul.bf16.vlgmr.msra.gmra.mxu2 %v215_v45  ;;  %v1028_v39 = vld [vmem:[%s1504_s8 + $0x68] sm:$0xff] }
  0x23   :  { %841 = vmatmul.msk.bf16.vlgmr.msra.gmra.mxu3 %vm1238_vm3, %v840_v47  ;;  %110 = vmatpush.msra.mxu1 %v87_v18  ;;  %v1036_v47 = vld [vmem:[%s1504_s8 + $0xa8] sm:$0xff] }
  0x24   :  { %728 = vmatpush.bf16.msrb.mxu3 %v1038_v38 }
  0x25   :  { %111 = vmatpush.msra.mxu1 %v86_v20 }
  0x26   :  { %434 = vmatpush.bf16.msrb.mxu0 %v1013_v46  ;;  %v1022_v46 = vld [vmem:[%s1504_s8 + $0x38] sm:$0xff] }
  0x27   :  { %112 = vmatpush.msra.mxu1 %v85_v22  ;;  %643 = vmatpush.bf16.msrb.mxu2 %v1022_v46 }
  0x28   :  { %729 = vmatpush.bf16.msrb.mxu3 %v1037_v42 }
  0x29   :  { %113 = vmatpush.msra.mxu1 %v84_v24 }
  0x2a   :  { %435 = vmatpush.bf16.msrb.mxu0 %v1012_v49  ;;  %v1025_v49 = vld [vmem:[%s1504_s8 + $0x50] sm:$0xff] }
  0x2b   :  { %114 = vmatpush.msra.mxu1 %v83_v33  ;;  %644 = vmatpush.bf16.msrb.mxu2 %v1021_v53 }
  0x2c   :  { %730 = vmatpush.bf16.msrb.mxu3 %v1036_v47 }
  0x2d   :  { %115 = vmatpush.msra.mxu1 %v82_v34 }
  0x2e   :  { %436 = vmatpush.bf16.msrb.mxu0 %v1011_v52 }
  0x2f   :  { %116 = vmatpush.msra.mxu1 %v81_v35  ;;  %645 = vmatpush.bf16.msrb.mxu2 %v1020_v56 }
  0x30   :  { %731 = vmatpush.bf16.msrb.mxu3 %v1035_v54 }
  0x31   :  { %576 = vmatpush.bf16.msrb.mxu1 %v1030_v36 }
  0x32   :  { %437 = vmatpush.bf16.msrb.mxu0 %v1010_v55  ;;  %294 = vmatmul.bf16.gmra.mxu2 %v216_v58  ;;  %v1024_v55 = vld [vmem:[%s1504_s8 + $0x48] sm:$0xff]  ;;  %v1023_v58 = vld [vmem:[%s1504_s8 + $0x40] sm:$0xff] }
  0x33   :  { %844 = vmatmul.msk.bf16.gmra.mxu3 %vm1279_vm5, %v843_v62  ;;  %646 = vmatpush.bf16.msrb.mxu2 %v1019_v59  ;;  %v1032_v62 = vld [vmem:[%s1504_s8 + $0x88] sm:$0xff] }
  0x34   :  { %732 = vmatpush.bf16.msrb.mxu3 %v1034_v57 }
  0x35   :  { %577 = vmatpush.bf16.msrb.mxu1 %v1029_v37 }
  0x36   :  { %438 = vmatpush.bf16.msrb.mxu0 %v1009_v61  ;;  %v1018_v61 = vld [vmem:[%s1504_s8 + $0x18] sm:$0xff] }
  0x37   :  { %647 = vmatpush.bf16.msrb.mxu2 %v1018_v61 }
  0x38   :  { %733 = vmatpush.bf16.msrb.mxu3 %v1033_v60 }
  0x39   :  { %578 = vmatpush.bf16.msrb.mxu1 %v1028_v39 }
  0x3a   :  { %439 = vmatpush.bf16.msrb.mxu0 %v1008_v4  ;;  %v1031_v4 = vld [vmem:[%s1504_s8 + $0x80] sm:$0xff] }
  0x3b   :  { %648 = vmatpush.bf16.msrb.mxu2 %v1017_v3 }
  0x3c   :  { %734 = vmatpush.bf16.msrb.mxu3 %v1032_v62 }
  0x3d   :  { %579 = vmatpush.bf16.msrb.mxu1 %v1027_v40 }
  0x3e   :  { %440 = vmatpush.bf16.msrb.mxu0 %v1007_v9 }
  0x3f   :  { %649 = vmatpush.bf16.msrb.mxu2 %v1016_v5 }
  0x40   :  { %735 = vmatpush.bf16.msrb.mxu3 %v1031_v4 }
  0x41   :  { %879 = vmatmul.msk.bf16.vlgmr.msrb.gmra.mxu0 %vm1319_vm8, %v878_v14  ;;  %580 = vmatpush.bf16.msrb.mxu1 %v1026_v43 }
  0x43   :  { %650 = vmatpush.bf16.msrb.mxu2 %v1015_v7 }
  0x45   :  { %581 = vmatpush.bf16.msrb.mxu1 %v1025_v49 }
  0x49   :  { %582 = vmatpush.bf16.msrb.mxu1 %v1024_v55 }
  0x4d   :  { %583 = vmatpush.bf16.msrb.mxu1 %v1023_v58 }
  0x51   :  { %882 = vmatmul.msk.bf16.gmra.mxu0 %vm1353_vm10, %v881_v31 }
  0x9e   :  { %v77_v44 = vpop.f32.mrf.mxu0 }
  0x9f   :  { %v78_v45 = vadd.f32 %v1040_v41, %v77_v44 }
  0xa1   :  { %v80_v52 = vmax.f32 %v78_v45, 0.0 }
  0xa3   :  { %117 = vmatmul.f32.vlgmr.msra.gmra.mxu1 %v80_v52 }
  0xa5   :  { %v290_v1 = vpop.f32.mrf.mxu2 }
  0xa6   :  { %v357_v2 = vpop.f32.mrf.mxu3 }
  0xa7   :  { %v358_v10 = vadd.f32 %v357_v2, %v290_v1 }
  0xad   :  { %v292_v6 = vpop.f32.mrf.mxu2 }
  0xae   :  { %v359_v8 = vpop.f32.mrf.mxu3 }
  0xaf   :  { %v360_v13 = vadd.f32 %v359_v8, %v292_v6 }
  0xb5   :  { %v295_v18 = vpop.f32.mrf.mxu2 }
  0xb6   :  { %v362_v20 = vpop.f32.mrf.mxu3 }
  0xb7   :  { %v363_v23 = vadd.f32 %v362_v20, %v295_v18 }
  0xbd   :  { %v297_v34 = vpop.f32.mrf.mxu2 }
  0xbe   :  { %v442_v9 = vpop.f32.mrf.mxu0  ;;  %v364_v35 = vpop.f32.mrf.mxu3 }
  0xbf   :  { %v452_v11 = vadd.f32 %v442_v9, %v358_v10  ;;  %v365_v39 = vadd.f32 %v364_v35, %v297_v34 }
  0xc1   :  { %v460_v16 = vadd.f32 %v1041_v12, %v452_v11 }
  0xc3   :  { %v464_v22 = vmax.f32 %v460_v16, 0.0 }
  0xc5   :  { %v480_v38 = vrot.slane %v464_v22, 1  ;;  %v468_v52 = vrot.slane %v464_v22, 7 }
  0xc6   :  { %v444_v14 = vpop.f32.mrf.mxu0 }
  0xc7   :  { %v453_v17 = vadd.f32 %v444_v14, %v360_v13 }
  0xc9   :  { %v461_v21 = vadd.f32 %v1041_v12, %v453_v17 }
  0xcb   :  { %v465_v24 = vmax.f32 %v461_v21, 0.0  ;;  %v157_v21 = vshra.s32 %v1194_v29, 4 }
  0xcd   :  { %v510_v25 = vpack.c.bf16 %v465_v24, %v464_v22  ;;  %v481_v36 = vrot.slane %v465_v24, 1  ;;  %v469_v47 = vrot.slane %v465_v24, 7  ;;  %v1043_v24 = vld [vmem:[%s1505_s9] ss:$0 sm:$0xff]  ;;  %vm161_vm15 = vcmp.eq.s32.totalorder %v157_v21, 1 }
  0xce   :  { %v447_v30 = vpop.f32.mrf.mxu0 }
  0xcf   :  { %v454_v31 = vadd.f32 %v447_v30, %v363_v23  ;;  %584 = vmatmul.bf16.vlgmr.msrb.gmra.mxu1 %v510_v25  ;;  %v486_v44 = vsel %vm188_vm6, %v480_v38, %v481_v36  ;;  %v474_v55 = vsel %vm175_vm0, %v468_v52, %v469_v47 }
  0xd1   :  { %v462_v33 = vadd.f32 %v1041_v12, %v454_v31 }
  0xd3   :  { %v466_v37 = vmax.f32 %v462_v33, 0.0 }
  0xd5   :  { %v482_v40 = vrot.slane %v466_v37, 1  ;;  %v470_v61 = vrot.slane %v466_v37, 7 }
  0xd6   :  { %v449_v41 = vpop.f32.mrf.mxu0 }
  0xd7   :  { %v455_v42 = vadd.f32 %v449_v41, %v365_v39  ;;  %v485_v43 = vsel %vm188_vm6, %v481_v36, %v482_v40  ;;  %v473_v1 = vsel %vm175_vm0, %v469_v47, %v470_v61 }
  0xd8   :  { %v986_v45 = vpack.c.bf16 %v485_v43, %v486_v44 }
  0xd9   :  { %v463_v46 = vadd.f32 %v1041_v12, %v455_v42 }
  0xda   :  { %987 = vmatmul.msk.bf16.vlgmr.msrb.gmra.mxu3 %vm1319_vm8, %v986_v45  ;;  %v159_v45 = vshra.s32 %v1253_v51, 4 }
  0xdb   :  { %v467_v49 = vmax.f32 %v463_v46, 0.0 }
  0xdc   :  { %vm163_vm1 = vcmp.eq.s32.totalorder %v159_v45, 1 }
  0xdd   :  { %v471_v53 = vrot.slane %v467_v49, 7  ;;  %v511_v54 = vpack.c.bf16 %v467_v49, %v466_v37  ;;  %v483_v58 = vrot.slane %v467_v49, 1  ;;  %v158_v37 = vshra.s32 %v1284_v0, 4 }
  0xdf   :  { %589 = vmatmul.bf16.gmra.mxu1 %v511_v54  ;;  %v475_v56 = vsel %vm175_vm0, %v471_v53, %v468_v52  ;;  %v484_v15 = vsel %vm188_vm6, %v482_v40, %v483_v58  ;;  %v487_v59 = vsel %vm188_vm6, %v483_v58, %v480_v38  ;;  %v472_v62 = vsel %vm175_vm0, %v470_v61, %v471_v53 }
  0xe0   :  { %v948_v57 = vpack.c.bf16 %v474_v55, %v475_v56  ;;  %v989_v60 = vpack.c.bf16 %v487_v59, %v484_v15  ;;  %v951_v2 = vpack.c.bf16 %v472_v62, %v473_v1  ;;  %vm162_vm0 = vcmp.eq.s32.totalorder %v158_v37, 1 }
  0xe1   :  { %v160_v55 = vshra.s32 %v1335_v19, 4 }
  0xe2   :  { %949 = vmatmul.msk.bf16.vlgmr.msrb.gmra.mxu2 %vm1238_vm3, %v948_v57 }
  0xe3   :  { %vm164_vm2 = vcmp.eq.s32.totalorder %v160_v55, 1 }
  0xea   :  { %990 = vmatmul.msk.bf16.gmra.mxu3 %vm1353_vm10, %v989_v60 }
  0xf2   :  { %952 = vmatmul.msk.bf16.gmra.mxu2 %vm1279_vm5, %v951_v2 }
 0x120   :  { %v118_v3 = vpop.f32.mrf.mxu1 }
 0x121   :  { %v119_v4 = vadd.f32 %v1042_v48, %v118_v3 }
 0x123   :  { %v121_v5 = vsub.f32 0.0, %v119_v4 }
 0x125   :  { %v122_v32 = vmul.f32 1.442695, %v121_v5 }
 0x127   :  { %1044 = vpow2.f32 %v122_v32 }
 0x12d   :  { %v1045_v6 = vpop.eup %1044 }
 0x12e   :  { %v124_v7 = vadd.f32 1.0, %v1045_v6 }
 0x130   :  { %1046 = vrcp.f32 %v124_v7  ;;  %vm130_vm11 = vweird.f32 %v124_v7  ;;  %v136_v63 = vand.u32 2147483648, %v124_v7  ;;  %v134_v13 = vand.u32 2147483647, %v124_v7 }
 0x132   :  { %v137_v16 = vor.u32 1.1754944e-38, %v136_v63  ;;  %vm135_vm14 = vcmp.eq.f32.partialorder %v134_v13, 8.507059e+37 }
 0x136   :  { %v1047_v8 = vpop.eup %1046 }
 0x137   :  { %v126_v9 = vmul.f32 %v1047_v8, %v124_v7  ;;  %vm131_vm12 = vweird.f32 %v1047_v8 }
 0x138   :  { %vm132_vm13 = vmor %vm130_vm11, %vm131_vm12 }
 0x139   :  { %v127_v10 = vsub.f32 1.0, %v126_v9 }
 0x13b   :  { %v128_v11 = vmul.f32 %v1047_v8, %v127_v10 }
 0x13d   :  { %v129_v12 = vadd.f32 %v1047_v8, %v128_v11 }
 0x13f   :  { %v133_v18 = vsel %vm132_vm13, %v1047_v8, %v129_v12 }
 0x140   :  { %v138_v20 = vsel %vm135_vm14, %v137_v16, %v133_v18 }
 0x141   :  { %v165_v25 = vperm.slane %v138_v20, 1  ;;  %v166_v30 = vperm.slane %v138_v20, 0 }
 0x143   :  { %v167_v35 = vsel %vm161_vm15, %v165_v25, %v166_v30  ;;  %v168_v44 = vsel %vm162_vm0, %v165_v25, %v166_v30  ;;  %v169_v54 = vsel %vm163_vm1, %v165_v25, %v166_v30  ;;  %v170_v61 = vsel %vm164_vm2, %v165_v25, %v166_v30 }
 0x14c   :  { %v585_v14 = vpop.f32.mrf.mxu1 }
 0x154   :  { %v587_v33 = vpop.f32.mrf.mxu1 }
 0x15c   :  { %v590_v43 = vpop.f32.mrf.mxu1 }
 0x15d   :  { %v737_v17 = vpop.f32.mrf.mxu3 }
 0x164   :  { %v592_v57 = vpop.f32.mrf.mxu1 }
 0x165   :  { %v652_v22 = vpop.f32.mrf.mxu2  ;;  %v739_v36 = vpop.f32.mrf.mxu3 }
 0x166   :  { %v653_v23 = vadd.f32 %v652_v22, %v585_v14 }
 0x168   :  { %v747_v31 = vadd.f32 %v737_v17, %v653_v23 }
 0x16a   :  { %v755_v34 = vadd.f32 %v1043_v24, %v747_v31 }
 0x16c   :  { %v759_v38 = vmul.f32 %v755_v34, %v167_v35 }
 0x16d   :  { %v654_v39 = vpop.f32.mrf.mxu2  ;;  %v742_v47 = vpop.f32.mrf.mxu3 }
 0x16e   :  { %v763_v29 = vadd.f32 %v759_v38, %v1182_v26  ;;  %v655_v40 = vadd.f32 %v654_v39, %v587_v33 }
 0x170   :  { %767 = vst [vmem:[%s1506_s10] sm:$0xff] %v763_v29  ;;  %v748_v41 = vadd.f32 %v739_v36, %v655_v40 }
 0x172   :  { %v756_v42 = vadd.f32 %v1043_v24, %v748_v41 }
 0x174   :  { %v760_v46 = vmul.f32 %v756_v42, %v168_v44 }
 0x175   :  { %v657_v49 = vpop.f32.mrf.mxu2  ;;  %v744_v59 = vpop.f32.mrf.mxu3 }
 0x176   :  { %v764_v0 = vadd.f32 %v760_v46, %v1187_v27  ;;  %v658_v52 = vadd.f32 %v657_v49, %v590_v43 }
 0x178   :  { %768 = vst [vmem:[%s1506_s10 + $0x8] sm:$0xff] %v764_v0  ;;  %v749_v26 = vadd.f32 %v742_v47, %v658_v52 }
 0x17a   :  { %v757_v53 = vadd.f32 %v1043_v24, %v749_v26 }
 0x17c   :  { %v761_v56 = vmul.f32 %v757_v53, %v169_v54 }
 0x17d   :  { %v659_v58 = vpop.f32.mrf.mxu2 }
 0x17e   :  { %v765_v51 = vadd.f32 %v761_v56, %v1250_v50  ;;  %v660_v15 = vadd.f32 %v659_v58, %v592_v57 }
 0x180   :  { %769 = vst [vmem:[%s1506_s10 + $0x10] sm:$0xff] %v765_v51  ;;  %v750_v27 = vadd.f32 %v744_v59, %v660_v15 }
 0x182   :  { %v758_v60 = vadd.f32 %v1043_v24, %v750_v27 }
 0x184   :  { %v762_v62 = vmul.f32 %v758_v60, %v170_v61 }
 0x186   :  { %v766_v1 = vadd.f32 %v762_v62, %v1192_v28 }
 0x188   :  { %770 = vst [vmem:[%s1506_s10 + $0x18] sm:$0xff] %v766_v1 }

</bundles_post_ra>
